<compile_context>
chip_gen: v7x
topology: tpu7x:2x2x1
jax: 0.10.0
libtpu: 0.0.40
codegen_flags: <defaults>
</compile_context>

<pallas_src>
import math

import jax
import jax.numpy as jnp
import numpy as np
from jax.experimental import pallas as pl
from jax.experimental.pallas import tpu as pltpu


# ---------------------------------------------------------------------------
# Kernels
# ---------------------------------------------------------------------------

def _ffn_kernel_fused(x_ref, w_ref, b_ref, o_ref):
    """Single-K-step path: whole (padded) reduction dim resident.  y = x @ W + b."""
    y = jnp.dot(x_ref[...].astype(jnp.bfloat16), w_ref[...],
                preferred_element_type=jnp.float32)
    o_ref[...] = y + b_ref[...]


def _ffn_kernel_ktiled(x_ref, w_ref, b_ref, o_ref, acc_ref):
    """K-tiled path: accumulate partial products in f32 scratch, finalize with bias."""
    k = pl.program_id(2)

    @pl.when(k == 0)
    def _():
        acc_ref[...] = jnp.zeros_like(acc_ref)

    acc_ref[...] += jnp.dot(x_ref[...].astype(jnp.bfloat16), w_ref[...],
                            preferred_element_type=jnp.float32)

    @pl.when(k == pl.num_programs(2) - 1)
    def _():
        o_ref[...] = acc_ref[...] + b_ref[...]


# ---------------------------------------------------------------------------
# Tiling helpers
# ---------------------------------------------------------------------------

def _round_up(x, m):
    return ((x + m - 1) // m) * m


def _vmem_budget():
    """(vmem_limit_bytes, tile-planning budget) derived from the local chip generation."""
    try:
        cap = int(pltpu.get_tpu_info().vmem_capacity_bytes)
    except Exception:
        cap = 64 * 1024 * 1024  # conservative: v7x per-TensorCore VMEM
    limit = max(32 * 1024 * 1024, min(int(cap * 0.75), 100 * 1024 * 1024))
    return limit, int(limit * 0.85)


def _largest_tile(total, cap):
    """Largest multiple of 128 that divides `total` (itself a multiple of 128), <= cap."""
    t = min(total, max(128, (cap // 128) * 128))
    while total % t:
        t -= 128
    return t


def _choose_feature_tiles(fp_in, fp_out, budget):
    """Pick (TK, TN).  Keep the whole bf16 weight resident when it is comfortably small."""
    if fp_in * fp_out * 2 <= budget // 2:
        return fp_in, fp_out
    tn = _largest_tile(fp_out, 512)                      # lane-dense, feeds 256-wide MXU
    tk_cap = max(128, budget // (4 * tn))                # double-buffered bf16 K-slice
    tk = _largest_tile(fp_in, tk_cap)
    return tk, tn


def _vmem_block_bytes(tm, tk, tn, w_bufs):
    x_b = tm * tk * 4 * 2          # f32 x tile, double-buffered
    w_b = tk * tn * 2 * w_bufs     # bf16 weight tile
    b_b = tn * 4 * 2               # bias
    o_b = tm * tn * 4 * 2          # f32 out tile, double-buffered
    a_b = tm * tn * 4              # accumulator scratch (worst case)
    return x_b + w_b + b_b + o_b + a_b


# ---------------------------------------------------------------------------
# Parameter prep (one-time, outside the hot path)
# ---------------------------------------------------------------------------

def prepare_linear_params(weight, bias):
    """PyTorch (out,in) f32 weight -> padded, transposed (in,out) bf16; bias -> padded f32."""
    f_out, f_in = weight.shape
    fp_in = _round_up(f_in, 128)
    fp_out = _round_up(f_out, 128)
    w_p = jnp.zeros((fp_in, fp_out), jnp.bfloat16)
    w_p = w_p.at[:f_in, :f_out].set(weight.T.astype(jnp.bfloat16))
    b_p = jnp.zeros((1, fp_out), jnp.float32)
    b_p = b_p.at[0, :f_out].set(bias.astype(jnp.float32))
    return w_p, b_p


# ---------------------------------------------------------------------------
# Forward
# ---------------------------------------------------------------------------

def _linear_forward(x, w_p, b_p, f_out, *, tile_budget_override=None):
    """x: (B, L, F_in) f32.  w_p: (Fp_in, Fp_out) bf16.  b_p: (1, Fp_out) f32."""
    B, L, f_in = x.shape
    fp_in, fp_out = w_p.shape
    M = B * L

    vmem_limit, budget = _vmem_budget()
    if tile_budget_override is not None:
        budget = tile_budget_override

    tk, tn = _choose_feature_tiles(fp_in, fp_out, budget)
    weight_resident = (tk == fp_in and tn == fp_out)
    w_bufs = 1 if weight_resident else 2

    # Row tile: as large as the VMEM budget allows, multiple of 8, capped near M/2 for
    # large M so the 'parallel' row axis can shard across v7x's two TensorCores.
    tm = min(1024, _round_up(M, 8))
    if M > 256:
        tm = min(tm, _round_up(pl.cdiv(M, 2), 8))
    while tm > 8 and _vmem_block_bytes(tm, tk, tn, w_bufs) > budget:
        tm = _round_up(tm // 2, 8)

    nm = pl.cdiv(M, tm)
    nn = fp_out // tn
    nk = fp_in // tk
    mp = nm * tm

    # Pad rows / lanes (no-op when already aligned; padding sliced away below).
    x2 = x.reshape(M, f_in)
    pad_rows = mp - M
    pad_cols = fp_in - f_in
    if pad_rows or pad_cols:
        x2 = jnp.pad(x2, ((0, pad_rows), (0, pad_cols)))

    x_spec = pl.BlockSpec((tm, tk), lambda i, j, k: (i, k))
    if weight_resident and nn == 1:
        # Constant block index over the whole grid -> single-buffer the resident weight.
        w_spec = pl.BlockSpec((tk, tn), lambda i, j, k: (0, 0),
                              pipeline_mode=pl.Buffered(1))
    else:
        w_spec = pl.BlockSpec((tk, tn), lambda i, j, k: (k, j))
    if nn == 1:
        b_spec = pl.BlockSpec((1, tn), lambda i, j, k: (0, 0),
                              pipeline_mode=pl.Buffered(1))
    else:
        b_spec = pl.BlockSpec((1, tn), lambda i, j, k: (0, j))
    o_spec = pl.BlockSpec((tm, tn), lambda i, j, k: (i, j))

    if nk == 1:
        kernel = _ffn_kernel_fused
        scratch = []
    else:
        kernel = _ffn_kernel_ktiled
        scratch = [pltpu.VMEM((tm, tn), jnp.float32)]

    out = pl.pallas_call(
        kernel,
        out_shape=jax.ShapeDtypeStruct((mp, fp_out), jnp.float32),
        grid_spec=pltpu.PrefetchScalarGridSpec(
            num_scalar_prefetch=0,
            grid=(nm, nn, nk),
            in_specs=[x_spec, w_spec, b_spec],
            out_specs=o_spec,
            scratch_shapes=scratch,
        ),
        compiler_params=pltpu.CompilerParams(
            dimension_semantics=("parallel", "parallel", "arbitrary"),
            vmem_limit_bytes=vmem_limit,
        ),
    )(x2, w_p, b_p)

    return out[:M, :f_out].reshape(B, L, f_out)


def make_attention_feed_forward(weight, bias):
    """One-time parameter prep + jitted forward mirroring AttentionFeedForward (eval mode)."""
    f_out = weight.shape[0]
    w_p, b_p = prepare_linear_params(weight, bias)

    def fwd(x):
        return _linear_forward(x, w_p, b_p, f_out)

    return jax.jit(fwd)


def attention_feed_forward_ref(x, weight, bias):
    """Pure-JAX f32 reference mirroring the PyTorch module in eval mode."""
    return x @ weight.T + bias


# ---------------------------------------------------------------------------
# Smoke test
# ---------------------------------------------------------------------------

if __name__ == "__main__":
    # Test 1: module-sized toy shapes (batch=2, seq=8, feature=32) -> lane padding path.
    B, L, F = 2, 8, 32
    key = jax.random.PRNGKey(0)
    kx, kw, kb = jax.random.split(key, 3)
    bound = 1.0 / math.sqrt(F)
    weight = jax.random.uniform(kw, (F, F), jnp.float32, -bound, bound)   # PyTorch (out, in)
    bias = jax.random.uniform(kb, (F,), jnp.float32, -bound, bound)
    x = jax.random.normal(kx, (B, L, F), jnp.float32)

    fwd = make_attention_feed_forward(weight, bias)
    out = jax.block_until_ready(fwd(x))
    ref = attention_feed_forward_ref(x, weight, bias)
    np.testing.assert_allclose(np.asarray(out), np.asarray(ref), rtol=2e-2, atol=2e-2)

    # Test 2: force the K-tiled accumulator path with a tiny artificial tile budget.
    B2, L2, F2 = 2, 8, 512
    kx2, kw2, kb2 = jax.random.split(jax.random.PRNGKey(1), 3)
    bound2 = 1.0 / math.sqrt(F2)
    weight2 = jax.random.uniform(kw2, (F2, F2), jnp.float32, -bound2, bound2)
    bias2 = jax.random.uniform(kb2, (F2,), jnp.float32, -bound2, bound2)
    x2 = jax.random.normal(kx2, (B2, L2, F2), jnp.float32)
    w_p2, b_p2 = prepare_linear_params(weight2, bias2)
    out2 = jax.block_until_ready(
        _linear_forward(x2, w_p2, b_p2, F2, tile_budget_override=256 * 1024))
    ref2 = attention_feed_forward_ref(x2, weight2, bias2)
    np.testing.assert_allclose(np.asarray(out2), np.asarray(ref2), rtol=2e-2, atol=2e-2)

    print("KERNEL_OK")
</pallas_src>

<mosaic_0001>
module attributes {stable_mosaic.version = 11 : i64} {
  func.func @_ffn_kernel_fused(%arg0: i32, %arg1: i32, %arg2: i32, %arg3: memref<16x128xf32, #tpu.memory_space<vmem>>, %arg4: memref<128x128xbf16, #tpu.memory_space<vmem>>, %arg5: memref<1x128xf32, #tpu.memory_space<vmem>>, %arg6: memref<16x128xf32, #tpu.memory_space<vmem>>) attributes {dimension_semantics = [#tpu.dimension_semantics<parallel>, #tpu.dimension_semantics<parallel>, #tpu.dimension_semantics<arbitrary>], iteration_bounds = array<i64: 1, 1, 1>, scalar_prefetch = 0 : i64, scratch_operands = 0 : i64, tpu.core_type = #tpu.core_type<tc>, window_params = [{transform_indices = @transform_0, window_bounds = array<i64: 16, 128>}, {pipeline_mode = #tpu.pipeline_mode<synchronous>, transform_indices = @transform_1, window_bounds = array<i64: 128, 128>}, {pipeline_mode = #tpu.pipeline_mode<synchronous>, transform_indices = @transform_2, window_bounds = array<i64: 1, 128>}, {transform_indices = @transform_3, window_bounds = array<i64: 16, 128>}]} {
    %c0 = arith.constant 0 : index
    %c0_0 = arith.constant 0 : index
    %0 = vector.load %arg3[%c0, %c0_0] : memref<16x128xf32, #tpu.memory_space<vmem>>, vector<16x128xf32>
    %1 = arith.truncf %0 : vector<16x128xf32> to vector<16x128xbf16>
    %c0_1 = arith.constant 0 : index
    %c0_2 = arith.constant 0 : index
    %2 = vector.load %arg4[%c0_1, %c0_2] : memref<128x128xbf16, #tpu.memory_space<vmem>>, vector<128x128xbf16>
    %cst = arith.constant dense<0.000000e+00> : vector<16x128xf32>
    %3 = tpu.matmul %1, %2, %cst {dimension_numbers = #tpu.dot_dimension_numbers<[1], [0], [0], [1], [0, 0, 1, 1], [], []>} : vector<16x128xbf16>, vector<128x128xbf16>, vector<16x128xf32> -> vector<16x128xf32>
    %c0_3 = arith.constant 0 : index
    %c0_4 = arith.constant 0 : index
    %4 = vector.load %arg5[%c0_3, %c0_4] : memref<1x128xf32, #tpu.memory_space<vmem>>, vector<1x128xf32>
    %5 = vector.broadcast %4 : vector<1x128xf32> to vector<16x128xf32>
    %6 = arith.addf %3, %5 : vector<16x128xf32>
    %c0_5 = arith.constant 0 : index
    %c0_6 = arith.constant 0 : index
    %7 = vector.load %arg6[%c0_5, %c0_6] : memref<16x128xf32, #tpu.memory_space<vmem>>, vector<16x128xf32>
    tpu.vector_store %arg6[%c0_5, %c0_6], %6 {strides = array<i32>} : memref<16x128xf32, #tpu.memory_space<vmem>>, vector<16x128xf32>,
    return
  }
  func.func @transform_0(%arg0: i32, %arg1: i32, %arg2: i32) -> (i32, i32) {
    %c0_i32 = arith.constant 0 : i32
    return %arg0, %arg2 : i32, i32
  }
  func.func @transform_1(%arg0: i32, %arg1: i32, %arg2: i32) -> (i32, i32) {
    %c0_i32 = arith.constant 0 : i32
    %c0_i32_0 = arith.constant 0 : i32
    %c0_i32_1 = arith.constant 0 : i32
    return %c0_i32, %c0_i32_0 : i32, i32
  }
  func.func @transform_2(%arg0: i32, %arg1: i32, %arg2: i32) -> (i32, i32) {
    %c0_i32 = arith.constant 0 : i32
    %c0_i32_0 = arith.constant 0 : i32
    %c0_i32_1 = arith.constant 0 : i32
    return %c0_i32, %c0_i32_0 : i32, i32
  }
  func.func @transform_3(%arg0: i32, %arg1: i32, %arg2: i32) -> (i32, i32) {
    %c0_i32 = arith.constant 0 : i32
    return %arg0, %arg1 : i32, i32
  }
}

</mosaic_0001>

<bundles_post_ra>
// kernel: fwd.1
= control target key start
LH: loop header
LB: loop body
LE: loop exit
PB: predicated region body
PF: predicated region fallthrough
CT: control target
= control target key end

     0   :  { %8 = vsyncpa [#allocation3], 0  ;;  %s226_s12 = smov [#allocation2]   ;;  %s278_s0 = inlined_call_operand.vmem [shape: f32[16,128], index: 0, kind: input, shape index: {}]   ;;  %s279_s1 = inlined_call_operand.hbm [shape: bf16[128,128], index: 1, kind: input, shape index: {}]   ;;  %s280_s2 = inlined_call_operand.vmem [shape: f32[1,128], index: 2, kind: input, shape index: {}]   ;;  %s281_s3 = inlined_call_operand.vmem [shape: f32[16,128], index: 3, kind: output, shape index: {}]  }
   0x1   :  { %s16_s13 = sshll.u32 %s226_s12, 4  ;;  %s202_s16 = scalar_lea.hbm %s279_s1, 1024  ;;  %s17_s13 = int_to_ptr.vmem [resolvable:$true] %s16_s13 }
   0x2   :  { %p203_p0 = scmp.ne.s32.totalorder %s279_s1, %s202_s16  ;;  %p206_p1 = scmp.lt.u32.totalorder %s202_s16, %s279_s1 }
   0x4   :  { %p208_p2 = pnand %p206_p1, %p203_p0 }
   0x6   :  { %211 = shalt.err (!%p208_p2)
}
   0x7   :  { %s212_s21 = scalar_lea.vmem %s17_s13, 1024  ;;  %p217_p4 = scmp.lt.s32.totalorder %s17_s13, %s17_s13 }
   0x8   :  { %p213_p3 = scmp.ne.s32.totalorder %s17_s13, %s212_s21  ;;  %p218_p5 = scmp.lt.s32.totalorder %s212_s21, %s212_s21 }
   0xa   :  { %p219_p6 = por %p218_p5, %p217_p4 }
   0xc   :  { %p220_p7 = pnand %p219_p6, %p213_p3 }
   0xe   :  { %223 = shalt.err (!%p220_p7)
}
   0xf   :  { %s227_s22 = smov 64   ;;  %s228_s23 = smov 4  }
  0x10   :  { %22 = dma.hbm_to_vmem [thread:$0]  %s279_s1, 1024, %s17_s13, [#allocation3], %s227_s22, %s227_s22, %s228_s23  }
  0x11   :  { %224 = dma.done.wait [#allocation3], 1024  }
  0x12   :  { %225 = vsyncadd [#allocation3], 4294966272  ;;  %v229_v0 = vmov 0.0   ;;  %vm230_vm0 = vmmov 0   ;;  %v194_v1 = vld [vmem:[#allocation2] sm:$0xff]   ;;  %v195_v2 = vld [vmem:[#allocation2 + $0x8] sm:$0xff]  }
  0x13   :  { %169 = vmatprep.subr.bf16.mxu0 %v229_v0  ;;  %185 = vmatprep.mubr.msk.bf16.mxu0 %vm230_vm0, %v229_v0  ;;  %v196_v3 = vld [vmem:[#allocation2 + $0x10] sm:$0xff]   ;;  %v197_v4 = vld [vmem:[#allocation2 + $0x18] sm:$0xff]   ;;  %v198_v5 = vld [vmem:[#allocation2 + $0x20] sm:$0xff]  }
  0x14   :  { %170 = vmatpush3.bf16.msra.mxu0 %v194_v1  ;;  %v199_v6 = vld [vmem:[#allocation2 + $0x28] sm:$0xff]   ;;  %v200_v7 = vld [vmem:[#allocation2 + $0x30] sm:$0xff]   ;;  %v201_v8 = vld [vmem:[#allocation2 + $0x38] sm:$0xff]  }
  0x15   :  { %171 = vmatprep.subr.bf16.mxu0 %v229_v0  ;;  %v29_v9 = vld [vmem:[%s278_s0] sm:$0xff]  ;;  %v30_v10 = vld [vmem:[%s278_s0 + $0x8] sm:$0xff] }
  0x16   :  { %v31_v11 = vpack.c.bf16 %v30_v10, %v29_v9  ;;  %v151_v12 = vld [vmem:[%s280_s2] ss:$0 sm:$0xff] }
  0x18   :  { %172 = vmatpush3.bf16.msra.mxu0 %v195_v2 }
  0x19   :  { %173 = vmatprep.subr.bf16.mxu0 %v229_v0 }
  0x1c   :  { %174 = vmatpush3.bf16.msra.mxu0 %v196_v3 }
  0x1d   :  { %175 = vmatprep.subr.bf16.mxu0 %v229_v0 }
  0x20   :  { %176 = vmatpush3.bf16.msra.mxu0 %v197_v4 }
  0x21   :  { %177 = vmatprep.subr.bf16.mxu0 %v229_v0 }
  0x24   :  { %178 = vmatpush3.bf16.msra.mxu0 %v198_v5 }
  0x25   :  { %179 = vmatprep.subr.bf16.mxu0 %v229_v0 }
  0x28   :  { %180 = vmatpush3.bf16.msra.mxu0 %v199_v6 }
  0x29   :  { %181 = vmatprep.subr.bf16.mxu0 %v229_v0 }
  0x2c   :  { %182 = vmatpush3.bf16.msra.mxu0 %v200_v7 }
  0x2d   :  { %183 = vmatprep.subr.bf16.mxu0 %v229_v0 }
  0x30   :  { %184 = vmatpush3.bf16.msra.mxu0 %v201_v8 }
  0x33   :  { %186 = vmatmul.mubr.bf16.vlgmr.msra.gmra.mrb[0].mxu0 %v31_v11 }
 0x106   :  { %v137_v13 = vpop.f32.mrb[0].mxu0 }
 0x107   :  { %v138_v14 = vadd.f32 %v151_v12, %v137_v13  ;;  %v187_v15 = vpop.f32.mrb[1].mxu0 }
 0x108   :  { %v140_v16 = vpop.f32.mrb[2].mxu0 }
 0x109   :  { %144 = vst [vmem:[%s281_s3] sm:$0xff] %v138_v14  ;;  %v141_v17 = vadd.f32 %v151_v12, %v140_v16  ;;  %v188_v18 = vpop.f32.mrb[3].mxu0 }
 0x10b   :  { %145 = vst [vmem:[%s281_s3 + $0x8] sm:$0xff] %v141_v17 }
 0x10c   :  { %150 = vsyncpa [#allocation3], 1 }

</bundles_post_ra>
